<compile_context>
chip_gen: v7x
topology: tpu7x:2x2x1
jax: 0.10.0
libtpu: 0.0.40
codegen_flags: <defaults>
</compile_context>

<pallas_src>
import jax
import jax.numpy as jnp
from jax.experimental import pallas as pl
from jax.experimental.pallas import tpu as pltpu

IN_DIM, H1, H2, OUT_DIM = 81, 128, 64, 4
DEFAULT_TB = 4096          # batch-row tile (multiple of 8)
_SPLIT_THRESHOLD = 1024    # enough rows to be worth >=2 grid steps (v7x megacore)


def _round_down8(n):
    return max((n // 8) * 8, 8)


def policy_net_kernel(x_ref, w1_ref, b1_ref, w2_ref, b2_ref, w3_ref, b3_ref, o_ref):
    # Cast x to bf16 in-kernel (no wrapper pad/cast pass over x).  K=81 is fine
    # for the MXU; accumulation stays f32, biases stay f32.
    x = x_ref[...].astype(jnp.bfloat16)                                 # (TB, 81)
    h1 = jnp.dot(x, w1_ref[...], preferred_element_type=jnp.float32)   # (TB, 128)
    h1 = jnp.maximum(h1 + b1_ref[...], 0.0).astype(jnp.bfloat16)
    h2 = jnp.dot(h1, w2_ref[...], preferred_element_type=jnp.float32)  # (TB, 64)
    h2 = jnp.maximum(h2 + b2_ref[...], 0.0).astype(jnp.bfloat16)
    out = jnp.dot(h2, w3_ref[...], preferred_element_type=jnp.float32) # (TB, 4)
    o_ref[...] = (out + b3_ref[...]).astype(o_ref.dtype)


def policy_net_forward(x, params, *, tb=DEFAULT_TB):
    """x: [B, 81] float32.  params: dict of bf16 weights (pre-transposed [in,out])
    and f32 biases.  Returns [B, 4] float32."""
    B = x.shape[0]
    w1, b1, w2, b2, w3, b3 = (params[k] for k in ("w1", "b1", "w2", "b2", "w3", "b3"))

    if B < 8:
        # Tiny batches: pad rows up to the 8-row sublane minimum (a few rows only).
        x = jnp.pad(x, ((0, 8 - B), (0, 0)))
    rows = x.shape[0]

    # Batch tile: multiple of 8, never larger than the array (so every block is
    # in-bounds or a trailing partial block), capped at `tb`.  If the whole batch
    # fits one tile but is big enough, split in two so the "parallel" batch axis
    # can use both TensorCores on v7x.
    if rows <= tb and rows >= _SPLIT_THRESHOLD:
        half_up8 = ((rows + 1) // 2 + 7) // 8 * 8
        TB = min(_round_down8(rows), half_up8)
    else:
        TB = min(tb, _round_down8(rows))
    grid = (pl.cdiv(rows, TB),)

    flops = 2 * B * (IN_DIM * H1 + H1 * H2 + H2 * OUT_DIM)
    bytes_accessed = (
        x.size * x.dtype.itemsize
        + B * OUT_DIM * 4
        + sum(int(a.size) * a.dtype.itemsize for a in (w1, b1, w2, b2, w3, b3))
    )

    out = pl.pallas_call(
        policy_net_kernel,
        out_shape=jax.ShapeDtypeStruct((rows, OUT_DIM), jnp.float32),
        grid=grid,
        in_specs=[
            pl.BlockSpec((TB, IN_DIM), lambda i: (i, 0)),    # x: tiled over rows
            pl.BlockSpec((IN_DIM, H1), lambda i: (0, 0)),    # weights/biases resident
            pl.BlockSpec((1, H1), lambda i: (0, 0)),
            pl.BlockSpec((H1, H2), lambda i: (0, 0)),
            pl.BlockSpec((1, H2), lambda i: (0, 0)),
            pl.BlockSpec((H2, OUT_DIM), lambda i: (0, 0)),
            pl.BlockSpec((1, OUT_DIM), lambda i: (0, 0)),
        ],
        out_specs=pl.BlockSpec((TB, OUT_DIM), lambda i: (i, 0)),
        compiler_params=pltpu.CompilerParams(
            dimension_semantics=("parallel",),               # megacore on v7x
            vmem_limit_bytes=32 * 1024 * 1024),              # covers v5e's 16 MiB default
        cost_estimate=pl.CostEstimate(
            flops=flops, transcendentals=0, bytes_accessed=bytes_accessed),
    )(x, w1, b1, w2, b2, w3, b3)

    return out[:B]


def init_params(key):
    """Init mirroring nn.Linear; weights stored pre-transposed [in,out] in bf16
    (no padding), biases stay f32 with shape (1, out)."""
    ks = jax.random.split(key, 6)

    def linear(kw, kb, fan_in, fan_out):
        bound = 1.0 / jnp.sqrt(fan_in)
        w = jax.random.uniform(kw, (fan_in, fan_out), jnp.float32, -bound, bound)
        b = jax.random.uniform(kb, (1, fan_out), jnp.float32, -bound, bound)
        return w.astype(jnp.bfloat16), b

    w1, b1 = linear(ks[0], ks[1], IN_DIM, H1)
    w2, b2 = linear(ks[2], ks[3], H1, H2)
    w3, b3 = linear(ks[4], ks[5], H2, OUT_DIM)
    return {"w1": w1, "b1": b1, "w2": w2, "b2": b2, "w3": w3, "b3": b3}


def reference_forward(x, p):
    """Pure-JAX reference with the same bf16 weights / f32 accumulation."""
    xb = x.astype(jnp.bfloat16)
    h1 = jnp.maximum(
        jnp.dot(xb, p["w1"], preferred_element_type=jnp.float32) + p["b1"], 0.0)
    h2 = jnp.maximum(
        jnp.dot(h1.astype(jnp.bfloat16), p["w2"],
                preferred_element_type=jnp.float32) + p["b2"], 0.0)
    return (jnp.dot(h2.astype(jnp.bfloat16), p["w3"],
                    preferred_element_type=jnp.float32) + p["b3"])


if __name__ == "__main__":
    key = jax.random.PRNGKey(0)
    kx, kp = jax.random.split(key)
    params = init_params(kp)

    # Small check (single grid step).
    B = 8
    x = jax.random.normal(kx, (B, IN_DIM), jnp.float32)
    out = jax.block_until_ready(policy_net_forward(x, params))
    ref = reference_forward(x, params)
    assert out.shape == (B, OUT_DIM), out.shape
    assert jnp.allclose(out, ref, atol=1e-2, rtol=1e-2), "mismatch vs reference (B=8)"

    # Multi-tile check: exercises the batch grid + the partial last block (300 = 2*128 + 44).
    B2 = 300
    x2 = jax.random.normal(jax.random.PRNGKey(1), (B2, IN_DIM), jnp.float32)
    out2 = jax.block_until_ready(policy_net_forward(x2, params, tb=128))
    ref2 = reference_forward(x2, params)
    assert out2.shape == (B2, OUT_DIM), out2.shape
    assert jnp.allclose(out2, ref2, atol=1e-2, rtol=1e-2), "mismatch vs reference (B=300)"

    print("KERNEL_OK")
</pallas_src>

<mosaic_0001>
module attributes {stable_mosaic.version = 11 : i64} {
  func.func @policy_net_kernel(%arg0: i32, %arg1: memref<8x81xf32, #tpu.memory_space<vmem>>, %arg2: memref<81x128xbf16, #tpu.memory_space<vmem>>, %arg3: memref<1x128xf32, #tpu.memory_space<vmem>>, %arg4: memref<128x64xbf16, #tpu.memory_space<vmem>>, %arg5: memref<1x64xf32, #tpu.memory_space<vmem>>, %arg6: memref<64x4xbf16, #tpu.memory_space<vmem>>, %arg7: memref<1x4xf32, #tpu.memory_space<vmem>>, %arg8: memref<8x4xf32, #tpu.memory_space<vmem>>) attributes {dimension_semantics = [#tpu.dimension_semantics<parallel>], iteration_bounds = array<i64: 1>, scalar_prefetch = 0 : i64, scratch_operands = 0 : i64, tpu.core_type = #tpu.core_type<tc>, window_params = [{transform_indices = @transform_0, window_bounds = array<i64: 8, 81>}, {pipeline_mode = #tpu.pipeline_mode<synchronous>, transform_indices = @transform_1, window_bounds = array<i64: 81, 128>}, {pipeline_mode = #tpu.pipeline_mode<synchronous>, transform_indices = @transform_2, window_bounds = array<i64: 1, 128>}, {pipeline_mode = #tpu.pipeline_mode<synchronous>, transform_indices = @transform_3, window_bounds = array<i64: 128, 64>}, {pipeline_mode = #tpu.pipeline_mode<synchronous>, transform_indices = @transform_4, window_bounds = array<i64: 1, 64>}, {pipeline_mode = #tpu.pipeline_mode<synchronous>, transform_indices = @transform_5, window_bounds = array<i64: 64, 4>}, {pipeline_mode = #tpu.pipeline_mode<synchronous>, transform_indices = @transform_6, window_bounds = array<i64: 1, 4>}, {transform_indices = @transform_7, window_bounds = array<i64: 8, 4>}]} {
    %c0 = arith.constant 0 : index
    %c0_0 = arith.constant 0 : index
    %0 = vector.load %arg1[%c0, %c0_0] : memref<8x81xf32, #tpu.memory_space<vmem>>, vector<8x81xf32>
    %1 = arith.truncf %0 : vector<8x81xf32> to vector<8x81xbf16>
    %c0_1 = arith.constant 0 : index
    %c0_2 = arith.constant 0 : index
    %2 = vector.load %arg2[%c0_1, %c0_2] : memref<81x128xbf16, #tpu.memory_space<vmem>>, vector<81x128xbf16>
    %cst = arith.constant dense<0.000000e+00> : vector<8x128xf32>
    %3 = tpu.matmul %1, %2, %cst {dimension_numbers = #tpu.dot_dimension_numbers<[1], [0], [0], [1], [0, 0, 1, 1], [], []>} : vector<8x81xbf16>, vector<81x128xbf16>, vector<8x128xf32> -> vector<8x128xf32>
    %c0_3 = arith.constant 0 : index
    %c0_4 = arith.constant 0 : index
    %4 = vector.load %arg3[%c0_3, %c0_4] : memref<1x128xf32, #tpu.memory_space<vmem>>, vector<1x128xf32>
    %5 = vector.broadcast %4 : vector<1x128xf32> to vector<8x128xf32>
    %6 = arith.addf %3, %5 : vector<8x128xf32>
    %cst_5 = arith.constant 0.000000e+00 : f32
    %7 = vector.broadcast %cst_5 : f32 to vector<8x128xf32>
    %8 = arith.maximumf %6, %7 : vector<8x128xf32>
    %9 = arith.truncf %8 : vector<8x128xf32> to vector<8x128xbf16>
    %c0_6 = arith.constant 0 : index
    %c0_7 = arith.constant 0 : index
    %10 = vector.load %arg4[%c0_6, %c0_7] : memref<128x64xbf16, #tpu.memory_space<vmem>>, vector<128x64xbf16>
    %cst_8 = arith.constant dense<0.000000e+00> : vector<8x64xf32>
    %11 = tpu.matmul %9, %10, %cst_8 {dimension_numbers = #tpu.dot_dimension_numbers<[1], [0], [0], [1], [0, 0, 1, 1], [], []>} : vector<8x128xbf16>, vector<128x64xbf16>, vector<8x64xf32> -> vector<8x64xf32>
    %c0_9 = arith.constant 0 : index
    %c0_10 = arith.constant 0 : index
    %12 = vector.load %arg5[%c0_9, %c0_10] : memref<1x64xf32, #tpu.memory_space<vmem>>, vector<1x64xf32>
    %13 = vector.broadcast %12 : vector<1x64xf32> to vector<8x64xf32>
    %14 = arith.addf %11, %13 : vector<8x64xf32>
    %cst_11 = arith.constant 0.000000e+00 : f32
    %15 = vector.broadcast %cst_11 : f32 to vector<8x64xf32>
    %16 = arith.maximumf %14, %15 : vector<8x64xf32>
    %17 = arith.truncf %16 : vector<8x64xf32> to vector<8x64xbf16>
    %c0_12 = arith.constant 0 : index
    %c0_13 = arith.constant 0 : index
    %18 = vector.load %arg6[%c0_12, %c0_13] : memref<64x4xbf16, #tpu.memory_space<vmem>>, vector<64x4xbf16>
    %cst_14 = arith.constant dense<0.000000e+00> : vector<8x4xf32>
    %19 = tpu.matmul %17, %18, %cst_14 {dimension_numbers = #tpu.dot_dimension_numbers<[1], [0], [0], [1], [0, 0, 1, 1], [], []>} : vector<8x64xbf16>, vector<64x4xbf16>, vector<8x4xf32> -> vector<8x4xf32>
    %c0_15 = arith.constant 0 : index
    %c0_16 = arith.constant 0 : index
    %20 = vector.load %arg7[%c0_15, %c0_16] : memref<1x4xf32, #tpu.memory_space<vmem>>, vector<1x4xf32>
    %21 = vector.broadcast %20 : vector<1x4xf32> to vector<8x4xf32>
    %22 = arith.addf %19, %21 : vector<8x4xf32>
    %c0_17 = arith.constant 0 : index
    %c0_18 = arith.constant 0 : index
    %23 = vector.load %arg8[%c0_17, %c0_18] : memref<8x4xf32, #tpu.memory_space<vmem>>, vector<8x4xf32>
    tpu.vector_store %arg8[%c0_17, %c0_18], %22 {strides = array<i32>} : memref<8x4xf32, #tpu.memory_space<vmem>>, vector<8x4xf32>,
    return
  }
  func.func @transform_0(%arg0: i32) -> (i32, i32) {
    %c0_i32 = arith.constant 0 : i32
    %c0_i32_0 = arith.constant 0 : i32
    return %arg0, %c0_i32 : i32, i32
  }
  func.func @transform_1(%arg0: i32) -> (i32, i32) {
    %c0_i32 = arith.constant 0 : i32
    %c0_i32_0 = arith.constant 0 : i32
    %c0_i32_1 = arith.constant 0 : i32
    return %c0_i32, %c0_i32_0 : i32, i32
  }
  func.func @transform_2(%arg0: i32) -> (i32, i32) {
    %c0_i32 = arith.constant 0 : i32
    %c0_i32_0 = arith.constant 0 : i32
    %c0_i32_1 = arith.constant 0 : i32
    return %c0_i32, %c0_i32_0 : i32, i32
  }
  func.func @transform_3(%arg0: i32) -> (i32, i32) {
    %c0_i32 = arith.constant 0 : i32
    %c0_i32_0 = arith.constant 0 : i32
    %c0_i32_1 = arith.constant 0 : i32
    return %c0_i32, %c0_i32_0 : i32, i32
  }
  func.func @transform_4(%arg0: i32) -> (i32, i32) {
    %c0_i32 = arith.constant 0 : i32
    %c0_i32_0 = arith.constant 0 : i32
    %c0_i32_1 = arith.constant 0 : i32
    return %c0_i32, %c0_i32_0 : i32, i32
  }
  func.func @transform_5(%arg0: i32) -> (i32, i32) {
    %c0_i32 = arith.constant 0 : i32
    %c0_i32_0 = arith.constant 0 : i32
    %c0_i32_1 = arith.constant 0 : i32
    return %c0_i32, %c0_i32_0 : i32, i32
  }
  func.func @transform_6(%arg0: i32) -> (i32, i32) {
    %c0_i32 = arith.constant 0 : i32
    %c0_i32_0 = arith.constant 0 : i32
    %c0_i32_1 = arith.constant 0 : i32
    return %c0_i32, %c0_i32_0 : i32, i32
  }
  func.func @transform_7(%arg0: i32) -> (i32, i32) {
    %c0_i32 = arith.constant 0 : i32
    %c0_i32_0 = arith.constant 0 : i32
    return %arg0, %c0_i32 : i32, i32
  }
}

</mosaic_0001>

<bundles_post_ra>
// kernel: tpu_custom_call.1
= control target key start
LH: loop header
LB: loop body
LE: loop exit
PB: predicated region body
PF: predicated region fallthrough
CT: control target
= control target key end

     0   :  { %v447_v0 = vmov 0.0   ;;  %vm448_vm0 = vmmov 0   ;;  %vm84_vm1 = vcmask 1040384   ;;  %v449_v10 = vmov 0   ;;  %s583_s1 = inlined_call_operand.vmem [shape: bf16[81,128], index: 1, kind: input, shape index: {}]   ;;  %s584_s3 = inlined_call_operand.vmem [shape: bf16[128,64], index: 3, kind: input, shape index: {}]   ;;  %s585_s0 = inlined_call_operand.vmem [shape: f32[8,81], index: 0, kind: input, shape index: {}]   ;;  %s586_s5 = inlined_call_operand.vmem [shape: bf16[64,4], index: 5, kind: input, shape index: {}]   ;;  %s587_s2 = inlined_call_operand.vmem [shape: f32[1,128], index: 2, kind: input, shape index: {}]   ;;  %s588_s4 = inlined_call_operand.vmem [shape: f32[1,64], index: 4, kind: input, shape index: {}]   ;;  %s589_s6 = inlined_call_operand.vmem [shape: f32[1,4], index: 6, kind: input, shape index: {}]   ;;  %s590_s7 = inlined_call_operand.vmem [shape: f32[8,4], index: 7, kind: output, shape index: {}]  }
   0x1   :  { %378 = vmatprep.subr.bf16.mxu0 %v447_v0  ;;  %v429_v1 = vld [vmem:[%s583_s1] sm:$0xff]   ;;  %390 = vmatprep.mubr.msk.bf16.mxu0 %vm448_vm0, %v447_v0  ;;  %v430_v2 = vld [vmem:[%s583_s1 + $0x8] sm:$0xff]   ;;  %v431_v3 = vld [vmem:[%s583_s1 + $0x10] sm:$0xff]   ;;  %v86_v11 = vsel %vm84_vm1, 65535, %v449_v10  ;;  %vm80_vm2 = vcmask 662528   ;;  %vm284_vm3 = vcmask 523264  }
   0x2   :  { %394 = vmatprep.subr.bf16.mxu1 %v447_v0  ;;  %410 = vmatprep.mubr.msk.bf16.mxu1 %vm448_vm0, %v447_v0  ;;  %v435_v4 = vld [vmem:[%s584_s3] sm:$0xff]   ;;  %v436_v5 = vld [vmem:[%s584_s3 + $0x8] sm:$0xff]   ;;  %v432_v6 = vld [vmem:[%s583_s1 + $0x18] sm:$0xff]   ;;  %vm328_vm4 = vcmask 31744  }
   0x3   :  { %379 = vmatpush3.bf16.msra.mxu0 %v429_v1  ;;  %395 = vmatpush3.bf16.msra.mxu1 %v435_v4  ;;  %v437_v7 = vld [vmem:[%s584_s3 + $0x10] sm:$0xff]   ;;  %v433_v8 = vld [vmem:[%s583_s1 + $0x20] sm:$0xff]   ;;  %v434_v9 = vld [vmem:[%s583_s1 + $0x28] ss:$0 sps:$4 sm:$0x11]  }
   0x4   :  { %380 = vmatprep.subr.bf16.mxu0 %v447_v0  ;;  %396 = vmatprep.subr.bf16.mxu1 %v447_v0  ;;  %v438_v12 = vld [vmem:[%s584_s3 + $0x18] sm:$0xff]   ;;  %v88_v13 = vand.u32 %v434_v9, %v86_v11  ;;  %v27_v14 = vld [vmem:[%s585_s0] sm:$0xff]  ;;  %v440_v17 = vld [vmem:[%s584_s3 + $0x28] sm:$0xff]  }
   0x5   :  { %v439_v15 = vld [vmem:[%s584_s3 + $0x20] sm:$0xff]   ;;  %v28_v16 = vpack.c.bf16 %v27_v14, %v27_v14  ;;  %v441_v18 = vld [vmem:[%s584_s3 + $0x30] sm:$0xff]   ;;  %v442_v19 = vld [vmem:[%s584_s3 + $0x38] sm:$0xff]  }
   0x6   :  { %v443_v20 = vld [vmem:[%s586_s5] sm:$0xff]   ;;  %v444_v21 = vld [vmem:[%s586_s5 + $0x8] sm:$0xff]   ;;  %v445_v30 = vld [vmem:[%s586_s5 + $0x10] sm:$0xff]  }
   0x7   :  { %381 = vmatpush3.bf16.msra.mxu0 %v430_v2  ;;  %397 = vmatpush3.bf16.msra.mxu1 %v436_v5  ;;  %v334_v22 = vld [vmem:[%s587_s2] ss:$0 sm:$0xff]  ;;  %v446_v31 = vld [vmem:[%s586_s5 + $0x18] sm:$0xff]  }
   0x8   :  { %382 = vmatprep.subr.bf16.mxu0 %v447_v0  ;;  %398 = vmatprep.subr.bf16.mxu1 %v447_v0  ;;  %v342_v32 = vld [vmem:[%s588_s4] ss:$0 sm:$0xff] }
   0x9   :  { %v351_v40 = vld [vmem:[%s589_s6] ss:$0 sm:$0xff] }
   0xb   :  { %383 = vmatpush3.bf16.msra.mxu0 %v431_v3  ;;  %399 = vmatpush3.bf16.msra.mxu1 %v437_v7 }
   0xc   :  { %384 = vmatprep.subr.bf16.mxu0 %v447_v0  ;;  %400 = vmatprep.subr.bf16.mxu1 %v447_v0 }
   0xf   :  { %385 = vmatpush3.bf16.msra.mxu0 %v432_v6  ;;  %401 = vmatpush3.bf16.msra.mxu1 %v438_v12 }
  0x10   :  { %386 = vmatprep.subr.bf16.mxu0 %v447_v0  ;;  %402 = vmatprep.subr.bf16.mxu1 %v447_v0 }
  0x13   :  { %387 = vmatpush3.bf16.msra.mxu0 %v433_v8  ;;  %403 = vmatpush3.bf16.msra.mxu1 %v439_v15 }
  0x14   :  { %388 = vmatprep.subr.bf16.mxu0 %v447_v0  ;;  %404 = vmatprep.subr.bf16.mxu1 %v447_v0 }
  0x17   :  { %389 = vmatpush3.bf16.msra.mxu0 %v88_v13  ;;  %405 = vmatpush3.bf16.msra.mxu1 %v440_v17 }
  0x18   :  { %414 = vmatprep.subr.bf16.mxu0 %v447_v0  ;;  %406 = vmatprep.subr.bf16.mxu1 %v447_v0 }
  0x1a   :  { %391 = vmatmul.mubr.msk.bf16.vlgmr.msra.gmra.mrb[0].mxu0 %vm80_vm2, %v28_v16 }
  0x1b   :  { %422 = vmatprep.mubr.msk.bf16.mxu0 %vm448_vm0, %v447_v0  ;;  %407 = vmatpush3.bf16.msra.mxu1 %v441_v18 }
  0x1c   :  { %408 = vmatprep.subr.bf16.mxu1 %v447_v0  ;;  %415 = vmatpush3.bf16.msra.mxu0 %v443_v20 }
  0x1d   :  { %416 = vmatprep.subr.bf16.mxu0 %v447_v0 }
  0x1f   :  { %409 = vmatpush3.bf16.msra.mxu1 %v442_v19 }
  0x20   :  { %417 = vmatpush3.bf16.msra.mxu0 %v444_v21 }
  0x21   :  { %418 = vmatprep.subr.bf16.mxu0 %v447_v0 }
  0x24   :  { %419 = vmatpush3.bf16.msra.mxu0 %v445_v30 }
  0x25   :  { %420 = vmatprep.subr.bf16.mxu0 %v447_v0 }
  0x28   :  { %421 = vmatpush3.bf16.msra.mxu0 %v446_v31 }
  0xed   :  { %v124_v23 = vpop.f32.mrb[0].mxu0 }
  0xee   :  { %v125_v24 = vadd.f32 %v334_v22, %v124_v23  ;;  %v392_v25 = vpop.f32.mrb[1].mxu0 }
  0xef   :  { %v127_v26 = vpop.f32.mrb[2].mxu0 }
  0xf0   :  { %v130_v27 = vmax.f32 %v125_v24, 0.0  ;;  %v393_v28 = vpop.f32.mrb[3].mxu0 }
  0xf2   :  { %v131_v29 = vpack.c.bf16 %v130_v27, %v130_v27 }
  0xf4   :  { %411 = vmatmul.mubr.bf16.vlgmr.msra.gmra.mrb[0].mxu1 %v131_v29 }
 0x1c7   :  { %v237_v33 = vpop.f32.mrb[0].mxu1 }
 0x1c8   :  { %v238_v34 = vadd.f32 %v342_v32, %v237_v33  ;;  %v412_v35 = vpop.f32.mrb[1].mxu1 }
 0x1c9   :  { %v240_v36 = vpop.f32.mrb[2].mxu1 }
 0x1ca   :  { %v243_v37 = vmax.f32 %v238_v34, 0.0  ;;  %v413_v38 = vpop.f32.mrb[3].mxu1 }
 0x1cc   :  { %v244_v39 = vpack.c.bf16 %v243_v37, %v243_v37 }
 0x1ce   :  { %423 = vmatmul.mubr.msk.bf16.vlgmr.msra.gmra.mrb[4].mxu0 %vm284_vm3, %v244_v39 }
 0x2a1   :  { %v322_v41 = vpop.f32.mrb[4].mxu0 }
 0x2a2   :  { %v323_v42 = vadd.f32 %v351_v40, %v322_v41  ;;  %v424_v43 = vpop.f32.mrb[5].mxu0 }
 0x2a3   :  { %v325_v44 = vpop.f32.mrb[6].mxu0 }
 0x2a4   :  { %329 = vst.msk [vmem:[%s590_s7] sm:$0xff] %vm328_vm4, %v323_v42  ;;  %v425_v45 = vpop.f32.mrb[7].mxu0 }

</bundles_post_ra>
